<compile_context>
chip_gen: v5e
topology: v5e:2x2
jax: 0.10.0
libtpu: 0.0.40
codegen_flags: <defaults>
</compile_context>

<pallas_src>
import math

import jax
import jax.numpy as jnp
from jax.experimental import pallas as pl
from jax.experimental.pallas import tpu as pltpu


def _gcn_att_first_kernel(att_ref, x_ref, w_ref, b_ref, o_ref):
    # att_ref: (tile_n, N)   x_ref: (N, F_in)   w_ref: (F_in, F_out)
    # b_ref:   (1, F_out)    o_ref: (tile_n, F_out)
    mixed = jnp.dot(att_ref[...], x_ref[...],
                    preferred_element_type=jnp.float32)        # (tile_n, F_in)
    out = jnp.dot(mixed, w_ref[...],
                  preferred_element_type=jnp.float32)          # (tile_n, F_out)
    o_ref[...] = (out + b_ref[...]).astype(o_ref.dtype)


def _gcn_weight_first_kernel(att_ref, x_ref, w_ref, b_ref, o_ref):
    support = jnp.dot(x_ref[...], w_ref[...],
                      preferred_element_type=jnp.float32)      # (N, F_out)
    out = jnp.dot(att_ref[...], support,
                  preferred_element_type=jnp.float32)          # (tile_n, F_out)
    o_ref[...] = (out + b_ref[...]).astype(o_ref.dtype)


def graph_convolution_layer(x, weight, att, bias=None, *, row_tiles=1):
    """x: [B, N, F_in]; weight: [F_in, F_out]; att: [N, N]; bias: [F_out] or None."""
    B, N, F_in = x.shape
    F_out = weight.shape[1]

    if bias is None:
        bias = jnp.zeros((F_out,), dtype=x.dtype)
    bias2d = bias.reshape(1, F_out)

    # Optional row tiling of att / output (only useful for very large node
    # counts).  Keep it only when the tile stays sublane-aligned.
    if row_tiles < 1 or N % row_tiles != 0 or (N // row_tiles) % 8 != 0:
        row_tiles = 1
    tile_n = N // row_tiles

    # Pick the cheaper matmul association statically from the shapes.
    kernel = _gcn_att_first_kernel if F_in <= F_out else _gcn_weight_first_kernel

    return pl.pallas_call(
        kernel,
        out_shape=jax.ShapeDtypeStruct((B, N, F_out), x.dtype),
        grid_spec=pltpu.PrefetchScalarGridSpec(
            num_scalar_prefetch=0,
            grid=(B, row_tiles),
            in_specs=[
                pl.BlockSpec((tile_n, N), lambda b, r: (r, 0)),         # att rows
                pl.BlockSpec((None, N, F_in), lambda b, r: (b, 0, 0)),  # x[b]
                pl.BlockSpec((F_in, F_out), lambda b, r: (0, 0)),       # weight
                pl.BlockSpec((1, F_out), lambda b, r: (0, 0)),          # bias
            ],
            out_specs=pl.BlockSpec((None, tile_n, F_out),
                                   lambda b, r: (b, r, 0)),
        ),
        compiler_params=pltpu.CompilerParams(
            dimension_semantics=("parallel", "parallel")),
    )(att, x, weight, bias2d)


if __name__ == "__main__":
    # Shapes consistent with the module: node_n=48 graph nodes,
    # in_features=32 -> out_features=64, batch=2.
    B, N, F_in, F_out = 2, 48, 32, 64

    key = jax.random.PRNGKey(0)
    kx, kw, ka, kb = jax.random.split(key, 4)

    # Deterministic parameter init mirroring reset_parameters():
    # uniform(-stdv, stdv) with stdv = 1/sqrt(out_features).
    stdv = 1.0 / math.sqrt(F_out)
    weight = jax.random.uniform(kw, (F_in, F_out), jnp.float32, -stdv, stdv)
    att = jax.random.uniform(ka, (N, N), jnp.float32, -stdv, stdv)
    bias = jax.random.uniform(kb, (F_out,), jnp.float32, -stdv, stdv)

    x = jax.random.normal(kx, (B, N, F_in), jnp.float32)

    out = graph_convolution_layer(x, weight, att, bias)
    out = jax.block_until_ready(out)

    # Pure-JAX reference using the original association
    # (support = x @ W; out = att @ support + bias).
    ref = jnp.einsum("nm,bmo->bno", att,
                     jnp.einsum("bni,io->bno", x, weight)) + bias
    assert out.shape == (B, N, F_out)
    assert jnp.allclose(out, ref, atol=1e-4, rtol=1e-4), "mismatch vs reference"

    print("KERNEL_OK")
</pallas_src>

<mosaic_0001>
module attributes {stable_mosaic.version = 11 : i64} {
  func.func @_gcn_att_first_kernel(%arg0: i32, %arg1: i32, %arg2: memref<48x48xf32, #tpu.memory_space<vmem>>, %arg3: memref<1x48x32xf32, #tpu.memory_space<vmem>>, %arg4: memref<32x64xf32, #tpu.memory_space<vmem>>, %arg5: memref<1x64xf32, #tpu.memory_space<vmem>>, %arg6: memref<1x48x64xf32, #tpu.memory_space<vmem>>) attributes {dimension_semantics = [#tpu.dimension_semantics<parallel>, #tpu.dimension_semantics<parallel>], iteration_bounds = array<i64: 2, 1>, scalar_prefetch = 0 : i64, scratch_operands = 0 : i64, tpu.core_type = #tpu.core_type<tc>, window_params = [{transform_indices = @transform_0, window_bounds = array<i64: 48, 48>}, {transform_indices = @transform_1, window_bounds = array<i64: 1, 48, 32>}, {pipeline_mode = #tpu.pipeline_mode<synchronous>, transform_indices = @transform_2, window_bounds = array<i64: 32, 64>}, {pipeline_mode = #tpu.pipeline_mode<synchronous>, transform_indices = @transform_3, window_bounds = array<i64: 1, 64>}, {transform_indices = @transform_4, window_bounds = array<i64: 1, 48, 64>}]} {
    %c0 = arith.constant 0 : index
    %c0_0 = arith.constant 0 : index
    %0 = vector.load %arg2[%c0, %c0_0] : memref<48x48xf32, #tpu.memory_space<vmem>>, vector<48x48xf32>
    %c0_1 = arith.constant 0 : index
    %c0_2 = arith.constant 0 : index
    %c0_3 = arith.constant 0 : index
    %1 = vector.load %arg3[%c0_1, %c0_2, %c0_3] : memref<1x48x32xf32, #tpu.memory_space<vmem>>, vector<1x48x32xf32>
    %2 = vector.shape_cast %1 : vector<1x48x32xf32> to vector<48x32xf32>
    %cst = arith.constant dense<0.000000e+00> : vector<48x32xf32>
    %3 = tpu.matmul %0, %2, %cst {dimension_numbers = #tpu.dot_dimension_numbers<[1], [0], [0], [1], [0, 0, 1, 1], [], []>} : vector<48x48xf32>, vector<48x32xf32>, vector<48x32xf32> -> vector<48x32xf32>
    %c0_4 = arith.constant 0 : index
    %c0_5 = arith.constant 0 : index
    %4 = vector.load %arg4[%c0_4, %c0_5] : memref<32x64xf32, #tpu.memory_space<vmem>>, vector<32x64xf32>
    %cst_6 = arith.constant dense<0.000000e+00> : vector<48x64xf32>
    %5 = tpu.matmul %3, %4, %cst_6 {dimension_numbers = #tpu.dot_dimension_numbers<[1], [0], [0], [1], [0, 0, 1, 1], [], []>} : vector<48x32xf32>, vector<32x64xf32>, vector<48x64xf32> -> vector<48x64xf32>
    %c0_7 = arith.constant 0 : index
    %c0_8 = arith.constant 0 : index
    %6 = vector.load %arg5[%c0_7, %c0_8] : memref<1x64xf32, #tpu.memory_space<vmem>>, vector<1x64xf32>
    %7 = vector.broadcast %6 : vector<1x64xf32> to vector<48x64xf32>
    %8 = arith.addf %5, %7 : vector<48x64xf32>
    %c0_9 = arith.constant 0 : index
    %c0_10 = arith.constant 0 : index
    %c0_11 = arith.constant 0 : index
    %9 = vector.load %arg6[%c0_9, %c0_10, %c0_11] : memref<1x48x64xf32, #tpu.memory_space<vmem>>, vector<1x48x64xf32>
    %10 = vector.shape_cast %9 : vector<1x48x64xf32> to vector<48x64xf32>
    %11 = vector.shape_cast %8 : vector<48x64xf32> to vector<1x48x64xf32>
    tpu.vector_store %arg6[%c0_9, %c0_10, %c0_11], %11 {strides = array<i32>} : memref<1x48x64xf32, #tpu.memory_space<vmem>>, vector<1x48x64xf32>,
    return
  }
  func.func @transform_0(%arg0: i32, %arg1: i32) -> (i32, i32) {
    %c0_i32 = arith.constant 0 : i32
    %c0_i32_0 = arith.constant 0 : i32
    return %arg1, %c0_i32 : i32, i32
  }
  func.func @transform_1(%arg0: i32, %arg1: i32) -> (i32, i32, i32) {
    %c0_i32 = arith.constant 0 : i32
    %c0_i32_0 = arith.constant 0 : i32
    %c0_i32_1 = arith.constant 0 : i32
    return %arg0, %c0_i32, %c0_i32_0 : i32, i32, i32
  }
  func.func @transform_2(%arg0: i32, %arg1: i32) -> (i32, i32) {
    %c0_i32 = arith.constant 0 : i32
    %c0_i32_0 = arith.constant 0 : i32
    %c0_i32_1 = arith.constant 0 : i32
    return %c0_i32, %c0_i32_0 : i32, i32
  }
  func.func @transform_3(%arg0: i32, %arg1: i32) -> (i32, i32) {
    %c0_i32 = arith.constant 0 : i32
    %c0_i32_0 = arith.constant 0 : i32
    %c0_i32_1 = arith.constant 0 : i32
    return %c0_i32, %c0_i32_0 : i32, i32
  }
  func.func @transform_4(%arg0: i32, %arg1: i32) -> (i32, i32, i32) {
    %c0_i32 = arith.constant 0 : i32
    %c0_i32_0 = arith.constant 0 : i32
    return %arg0, %arg1, %c0_i32 : i32, i32, i32
  }
}

</mosaic_0001>

<bundles_post_ra>
// kernel: tpu_custom_call.1
= control target key start
LH: loop header
LB: loop body
LE: loop exit
PB: predicated region body
PF: predicated region fallthrough
CT: control target
= control target key end

     0   :  { %9 = vsyncpa [#allocation3], 0  ;;  %s810_s0 = inlined_call_operand.vmem [shape: f32[48,48], index: 0, kind: input, shape index: {}]   ;;  %s811_s1 = inlined_call_operand.vmem [shape: f32[2,48,32], index: 1, kind: input, shape index: {}]   ;;  %s812_s2 = inlined_call_operand.vmem [shape: f32[32,64], index: 2, kind: input, shape index: {}]   ;;  %s813_s3 = inlined_call_operand.vmem [shape: f32[1,64], index: 3, kind: input, shape index: {}]   ;;  %s814_s4 = inlined_call_operand.hbm [shape: f32[2,48,64], index: 4, kind: output, shape index: {}]  }
   0x1   :  { %11 = vsyncpa [#allocation3 + $0x1], 0  ;;  %s674_s15 = smov 0   ;;  %s676_s16 = smov 0  }
   0x2   :  { %s678_s17 = smov 0   ;;  %s680_s18 = smov 0  }
   0x3   :  { %s682_s19 = smov 0   ;;  %s684_s20 = smov 0  }
   0x4 LB: > { %s474_s21 = sadd.s32 4294967295, %s645_s20   ;;  %s475_s22 = sadd.s32 4294967294, %s645_s20   ;;  %s645_s20 = sphi %s684_s20, %s17_s20   ;;  %s641_s19 = sphi %s682_s19, %s821_s19   ;;  %s637_s18 = sphi %s680_s18, %s820_s18   ;;  %s633_s17 = sphi %s678_s17, %s819_s17   ;;  %s629_s16 = sphi %s676_s16, %s818_s16   ;;  %s625_s15 = sphi %s674_s15, %s817_s15  }
   0x5   : > { %s29_s23 = sadd.s32 1, %s641_s19  ;;  %s132_s24 = sadd.s32 1, %s633_s17 }
   0x6   : > { %p31_p0 = scmp.ge.s32.totalorder %s29_s23, 2  ;;  %p142_p1 = scmp.ne.s32.totalorder %s633_s17, %s629_s16 }
   0x7   : > { %p143_p2 = scmp.eq.s32.totalorder %s474_s21, 1  ;;  %p148_p3 = scmp.ne.s32.totalorder %s629_s16, %s625_s15 }
   0x8   : > { %s823_s23 = smov (%p31_p0, %s29_s23), 0  ;;  %p149_p5 = scmp.eq.s32.totalorder %s475_s22, 1 }
   0x9   : > { %p714_p4 = por %p143_p2, %p142_p1  ;;  %s127_s26 = ssub.s32 %s641_s19, %s823_s23 }
   0xa   : > { %p479_p6 = scmp.ge.s32.totalorder %s645_s20, 1  ;;  %p130_p7 = scmp.eq.s32.totalorder %s127_s26, 0 }
   0xb   : > { %p721_p8 = por %p149_p5, %p148_p3  ;;  %p190_p9 = scmp.lt.s32.totalorder %s645_s20, 3 }
   0xc   : > { %s727_s28 = scalar_select %p130_p7, %s633_s17, %s132_s24  }
   0xd   : > { %p191_p10 = pnand %p479_p6, %p190_p9 }
   0xe   : > { %p227_p11 = scmp.lt.s32.totalorder (!%p191_p10), %s637_s18, 1  ;;  %s218_s12 = sand.u32 (!%p191_p10), 1, %s629_s16  }
   0xf   : > { %194 = sbr.rel (%p191_p10) target bundleno = 323 (0x143), region = 36 }
  0x10   : > { %s506_s13 = smul.u32 (!%p191_p10), 48, %s218_s12 }
  0x11   : > { %s508_s24 = smul.u32 (!%p191_p10), 48, %s637_s18 }
  0x12   : > { %s220_s22 = scalar_lea.vmem (!%p191_p10), [#allocation2], %s506_s13 }
  0x13   : > { %s382_s30 = scalar_lea.hbm (!%p191_p10), %s814_s4, %s508_s24  ;;  %s383_s5 = sshll.u32 (!%p191_p10), %s220_s22, 4  ;;  %s384_s5 = int_to_ptr.vmem [resolvable:$true] %s383_s5 }
  0x14   : > { %s228_s29 = scalar_select %p227_p11, %s637_s18, 1  ;;  %v302_v0 = vld [vmem:[%s812_s2 + $0x18] sm:$0xff]  ;;  %v301_v1 = vld [vmem:[%s812_s2 + $0x10] sm:$0xff]  ;;  %v300_v2 = vld [vmem:[%s812_s2 + $0x8] sm:$0xff]  ;;  %vm245_vm0 = vcmask 392192   ;;  %vm307_vm1 = vcmask 261120  }
  0x15   : > { %338 = vmatpush.msra.mxu1 %v302_v0  ;;  %502 = vmatpush.msra.mxu3 %v302_v0  ;;  %v233_v9 = vld [vmem:[%s810_s0] sm:$0xff]  ;;  %v236_v10 = vld [vmem:[%s810_s0 + $0x18] sm:$0xff]  ;;  %v234_v11 = vld [vmem:[%s810_s0 + $0x8] sm:$0xff]  ;;  %vm361_vm2 = vcmask 523264   ;;  %s385_s6 = sshll.u32 %s382_s30, 4  ;;  %s369_s18 = scalar_lea.sflag [#allocation3], %s218_s12  ;;  %s386_s6 = int_to_ptr.hbm [resolvable:$true] %s385_s6 }
  0x16   : > { %s507_s8 = smul.u32 48, %s228_s29  ;;  %v237_v12 = vld [vmem:[%s810_s0 + $0x20] sm:$0xff]  ;;  %v235_v13 = vld [vmem:[%s810_s0 + $0x10] sm:$0xff]  ;;  %v238_v14 = vld [vmem:[%s810_s0 + $0x28] sm:$0xff]  ;;  %s581_s7 = sshra.s32 %s386_s6, 4  ;;  %s582_s7 = int_to_ptr.hbm [resolvable:$true] %s581_s7 }
  0x17   : > { %339 = vmatpush.msra.mxu1 %v301_v1  ;;  %503 = vmatpush.msra.mxu3 %v301_v1  ;;  %v299_v15 = vld [vmem:[%s812_s2] sm:$0xff]  ;;  %p588_p1 = scmp.lt.s32.totalorder %s582_s7, %s814_s4 }
  0x18   : > { %s231_s11 = scalar_lea.vmem %s811_s1, %s507_s8  ;;  %v566_v22 = vld [vmem:[%s813_s3] ss:$0 sm:$0xff]  ;;  %s583_s8 = scalar_lea.hbm %s582_s7, 48 }
  0x19   : > { %v244_v3 = vld [vmem:[%s231_s11 + $0x28] sm:$0xff]  ;;  %v243_v4 = vld [vmem:[%s231_s11 + $0x20] sm:$0xff]  ;;  %v242_v5 = vld [vmem:[%s231_s11 + $0x18] sm:$0xff]  ;;  %340 = vmatpush.msra.mxu1 %v300_v2  ;;  %504 = vmatpush.msra.mxu3 %v300_v2  ;;  %p584_p12 = scmp.ne.s32.totalorder %s582_s7, %s583_s8 }
  0x1a   : > { %274 = vmatpush.msra.mxu0 %v244_v3  ;;  %496 = vmatpush.msra.mxu2 %v244_v3  ;;  %v241_v6 = vld [vmem:[%s231_s11 + $0x10] sm:$0xff]  ;;  %v240_v7 = vld [vmem:[%s231_s11 + $0x8] sm:$0xff]  ;;  %v239_v8 = vld [vmem:[%s231_s11] sm:$0xff]  ;;  %s587_s11 = scalar_lea.hbm %s814_s4, 96 }
  0x1b   : > { %341 = vmatpush.msra.mxu1 %v299_v15  ;;  %505 = vmatpush.msra.mxu3 %v299_v15  ;;  %p585_p13 = pnand %p584_p12, %p714_p4  ;;  %p589_p2 = scmp.lt.s32.totalorder %s587_s11, %s583_s8 }
  0x1c   : > { %275 = vmatpush.msra.mxu0 %v243_v4  ;;  %497 = vmatpush.msra.mxu2 %v243_v4 }
  0x1d   : > { %p586_p0 = pneg %p585_p13  ;;  %p590_p3 = por %p589_p2, %p588_p1 }
  0x1e   : > { %276 = vmatpush.msra.mxu0 %v242_v5  ;;  %498 = vmatpush.msra.mxu2 %v242_v5 }
  0x1f   : > { %p591_p5 = pnand %p590_p3, %p586_p0 }
  0x20   : > { %277 = vmatpush.msra.mxu0 %v241_v6  ;;  %499 = vmatpush.msra.mxu2 %v241_v6 }
  0x22   : > { %278 = vmatpush.msra.mxu0 %v240_v7  ;;  %500 = vmatpush.msra.mxu2 %v240_v7 }
  0x24   : > { %279 = vmatpush.msra.mxu0 %v239_v8  ;;  %501 = vmatpush.msra.mxu2 %v239_v8 }
  0x25   : > { %481 = vmatmul.msk.f32.vlgmr.msra.gmra.mxu0 %vm245_vm0, %v233_v9  ;;  %484 = vmatmul.msk.f32.vlgmr.msra.gmra.mxu2 %vm245_vm0, %v236_v10 }
  0x2d   : > { %482 = vmatmul.msk.f32.gmra.mxu0 %vm245_vm0, %v234_v11  ;;  %485 = vmatmul.msk.f32.gmra.mxu2 %vm245_vm0, %v237_v12 }
  0x35   : > { %483 = vmatmul.msk.f32.gmra.mxu0 %vm245_vm0, %v235_v13  ;;  %486 = vmatmul.msk.f32.gmra.mxu2 %vm245_vm0, %v238_v14 }
  0xa2   : > { %v281_v16 = vpop.f32.mrf.mxu0 }
  0xa3   : > { %487 = vmatmul.msk.f32.vlgmr.msra.gmra.mxu1 %vm307_vm1, %v281_v16 }
  0xa8   : > { %v290_v17 = vpop.f32.mrf.mxu2 }
  0xaa   : > { %v284_v18 = vpop.f32.mrf.mxu0 }
  0xab   : > { %488 = vmatmul.msk.f32.gmra.mxu1 %vm307_vm1, %v284_v18 }
  0xb0   : > { %v293_v19 = vpop.f32.mrf.mxu2 }
  0xb1   : > { %491 = vmatmul.msk.f32.vlgmr.msra.gmra.mxu3 %vm307_vm1, %v293_v19 }
  0xb2   : > { %v287_v20 = vpop.f32.mrf.mxu0 }
  0xb3   : > { %489 = vmatmul.msk.f32.gmra.mxu1 %vm307_vm1, %v287_v20 }
  0xb8   : > { %v296_v21 = vpop.f32.mrf.mxu2 }
  0xb9   : > { %492 = vmatmul.msk.f32.gmra.mxu3 %vm307_vm1, %v296_v21 }
  0xbb   : > { %490 = vmatmul.msk.f32.gmra.mxu1 %vm307_vm1, %v290_v17 }
 0x120   : > { %v343_v23 = vpop.f32.mrf.mxu1 }
 0x121   : > { %v344_v24 = vadd.f32 %v566_v22, %v343_v23 }
 0x123   : > { %362 = vst.msk [vmem:[%s220_s22] sm:$0xff] %vm361_vm2, %v344_v24 }
 0x128   : > { %v346_v25 = vpop.f32.mrf.mxu1 }
 0x129   : > { %v347_v26 = vadd.f32 %v566_v22, %v346_v25 }
 0x12b   : > { %363 = vst.msk [vmem:[%s220_s22 + $0x8] sm:$0xff] %vm361_vm2, %v347_v26 }
 0x130   : > { %v349_v27 = vpop.f32.mrf.mxu1 }
 0x131   : > { %v350_v28 = vadd.f32 %v566_v22, %v349_v27 }
 0x133   : > { %364 = vst.msk [vmem:[%s220_s22 + $0x10] sm:$0xff] %vm361_vm2, %v350_v28 }
 0x134   : > { %v355_v29 = vpop.f32.mrf.mxu3 }
 0x135   : > { %v356_v30 = vadd.f32 %v566_v22, %v355_v29 }
 0x137   : > { %366 = vst.msk [vmem:[%s220_s22 + $0x20] sm:$0xff] %vm361_vm2, %v356_v30 }
 0x138   : > { %v352_v31 = vpop.f32.mrf.mxu1 }
 0x139   : > { %v353_v32 = vadd.f32 %v566_v22, %v352_v31 }
 0x13b   : > { %365 = vst.msk [vmem:[%s220_s22 + $0x18] sm:$0xff] %vm361_vm2, %v353_v32 }
 0x13c   : > { %v358_v33 = vpop.f32.mrf.mxu3 }
 0x13d   : > { %v359_v34 = vadd.f32 %v566_v22, %v358_v33 }
 0x13f   : > { %367 = vst.msk [vmem:[%s220_s22 + $0x28] sm:$0xff] %vm361_vm2, %v359_v34 }
 0x140   : > { %594 = shalt.err (!%p591_p5)
}
 0x141   : > { %s647_s12 = smov 128   ;;  %s648_s21 = smov 8  }
 0x142   : > { %509 = dma.vmem_to_hbm [thread:$0]  (%p714_p4), %s384_s5, 768, %s386_s6, %s369_s18, %s647_s12, %s647_s12, %s648_s21  }
 0x143 PF: > { %p515_p6 = scmp.ge.s32.totalorder %s645_s20, 2  ;;  %s400_s22 = sand.u32 1, %s625_s15  }
 0x144   : > { %s401_s24 = scalar_lea.sflag [#allocation3], %s400_s22 }
 0x145   : > { %p512_p7 = pnand %p515_p6, %p721_p8 }
 0x147   : > { %p513_p9 = pneg %p512_p7 }
 0x149   : > { %620 = dma.done.wait (%p513_p9), %s401_s24, 768  }
 0x14a   : > { %622 = vsyncadd (%p513_p9), %s401_s24, 4294966528  ;;  %s17_s20 = sadd.s32 1, %s645_s20   ;;  %s817_s15 = smov %s629_s16 }
 0x14b   : > { %p14_p10 = scmp.ge.s32.totalorder %s17_s20, 4   ;;  %s818_s16 = smov %s633_s17 }
 0x14c   : > { %s819_s17 = smov %s727_s28  ;;  %s820_s18 = smov %s641_s19 }
 0x14d   : > { %s821_s19 = smov %s823_s23  ;;  %16 = sbr.rel (!%p14_p10) target bundleno = 4 (0x4), region = 74 }
 0x152   :  { %407 = vsyncpa [#allocation3], 1 }
 0x153   :  { %409 = vsyncpa [#allocation3 + $0x1], 1 }

</bundles_post_ra>
